<compile_context>
chip_gen: v6e
topology: v6e:2x2x1
jax: 0.10.0
libtpu: 0.0.40
codegen_flags: <defaults>
</compile_context>

<pallas_src>
import math

import jax
import jax.numpy as jnp
from jax import lax
from jax.experimental import pallas as pl
from jax.experimental.pallas import tpu as pltpu

# ---------------- hyperparameters (small, consistent with the module) ---------
B = 2            # batch
T = 8            # context_length / sequence length
E = 32           # emb_size
H = 4            # num_heads
HD = E // H      # head_dim
BT = B * T       # flattened rows
HBT = H * BT     # head-folded rows
NEG_INF = -1e30
SCALE = 1.0 / math.sqrt(HD)


# ----------------------------- Pallas kernel ----------------------------------
def multihead_kernel(x_ref, w_ref, bias_ref, bp_ref, o_ref):
    """Full MultiHead forward for the whole (flattened) batch in one step.

    x_ref    : (BT, E)            f32 activations
    w_ref    : (E, 2E + H*E)      bf16  [Wq*scale | Wk | per-head Wv_h@Wp_h]
    bias_ref : (H*BT, H*BT)       f32 additive mask (0 or -1e30)
    bp_ref   : (1, E)             f32 projection bias
    o_ref    : (BT, E)            output
    """
    x_bf = x_ref[...].astype(jnp.bfloat16)

    # Single fused projection: q | k | per-head (x @ Wv_h @ Wp_h).
    qkv = jnp.dot(x_bf, w_ref[...], preferred_element_type=jnp.float32)  # (BT, 2E+H*E)

    q = qkv[:, :E]                 # (BT, E)   scale already folded in
    k = qkv[:, E:2 * E]            # (BT, E)
    vp = qkv[:, 2 * E:]            # (BT, H*E) pre-projected values per head

    # Fold heads into the row axis: (H*BT, HD) / (H*BT, E).
    qf = jnp.concatenate([q[:, h * HD:(h + 1) * HD] for h in range(H)], axis=0)
    kf = jnp.concatenate([k[:, h * HD:(h + 1) * HD] for h in range(H)], axis=0)
    vpf = jnp.concatenate([vp[:, h * E:(h + 1) * E] for h in range(H)], axis=0)

    # Scores: ONE (64,8)x(8,64) matmul (q @ k^T), bf16 operands, f32 acc.
    s = lax.dot_general(qf.astype(jnp.bfloat16), kf.astype(jnp.bfloat16),
                        dimension_numbers=(((1,), (1,)), ((), ())),
                        preferred_element_type=jnp.float32)              # (HBT, HBT)
    # Additive block-diagonal (same head, same batch) + causal mask.
    s = s + bias_ref[...]

    # Numerically-stable softmax (exact divide, f32 VPU/EUP math).
    s = s - jnp.max(s, axis=-1, keepdims=True)
    p = jnp.exp(s)
    p = p * (1.0 / jnp.sum(p, axis=-1, keepdims=True))
    # NOTE: attention dropout / output dropout are identity at inference.

    # PV: ONE (64,64)x(64,32) matmul.  vpf already includes the output
    # projection (per-head), so un-interleaving the heads is just summing
    # the H row blocks.
    pv = jnp.dot(p.astype(jnp.bfloat16), vpf.astype(jnp.bfloat16),
                 preferred_element_type=jnp.float32)                     # (HBT, E)

    out = pv[0:BT, :]
    for h in range(1, H):
        out = out + pv[h * BT:(h + 1) * BT, :]
    out = out + bp_ref[...]

    o_ref[...] = out.astype(o_ref.dtype)


# ----------------------------- weight / mask prep ------------------------------
def _prep_weights(wq, wk, wv, wp):
    """Fuse [Wq*scale | Wk | per-head Wv_h @ Wp_h] into one bf16 (E, 2E+H*E)."""
    wq_s = wq * SCALE
    m = jnp.einsum('ehd,hdf->ehf',
                   wv.reshape(E, H, HD),
                   wp.reshape(H, HD, E)).reshape(E, H * E)   # concat_h(Wv_h @ Wp_h)
    w_all = jnp.concatenate([wq_s, wk, m], axis=1)           # (E, 2E + H*E)
    return w_all.astype(jnp.bfloat16)


def _mask_bias():
    """Additive mask over head-folded rows: 0 where (same head, same batch,
    causal), else -1e30.  Constant-folded under jit."""
    r = jnp.arange(HBT)
    same_blk = (r[:, None] // T) == (r[None, :] // T)   # same (head, batch) block
    causal = (r[:, None] % T) >= (r[None, :] % T)
    ok = jnp.logical_and(same_blk, causal)
    return jnp.where(ok, 0.0, NEG_INF).astype(jnp.float32)


# ----------------------------- wrapper -----------------------------------------
@jax.jit
def multihead_forward(x, wq, wk, wv, wp, bp):
    """MultiHead forward.  x: (B, T, E).  Single pallas_call, no grid."""
    Bn, Tn, En = x.shape
    xf = x.reshape(Bn * Tn, En)
    w_all = _prep_weights(wq, wk, wv, wp)
    bias = _mask_bias()
    out = pl.pallas_call(
        multihead_kernel,
        out_shape=jax.ShapeDtypeStruct((Bn * Tn, En), x.dtype),
        in_specs=[pl.BlockSpec(memory_space=pltpu.MemorySpace.VMEM)] * 4,
        out_specs=pl.BlockSpec(memory_space=pltpu.MemorySpace.VMEM),
    )(xf, w_all, bias, bp)
    return out.reshape(Bn, Tn, En)


# ------------------------- pure-JAX reference (for checking) -------------------
def reference_forward(x, wq, wk, wv, wp, bp):
    q = x @ wq
    k = x @ wk
    v = x @ wv
    causal = jnp.tril(jnp.ones((T, T), jnp.bool_))
    heads = []
    for h in range(H):
        sl = slice(h * HD, (h + 1) * HD)
        sc = jnp.einsum('btd,bsd->bts', q[..., sl], k[..., sl]) / math.sqrt(HD)
        sc = jnp.where(causal, sc, -jnp.inf)
        p = jax.nn.softmax(sc, axis=-1)
        heads.append(p @ v[..., sl])
    att = jnp.concatenate(heads, axis=-1)
    return att @ wp + bp


# --------------------------------- main -----------------------------------------
if __name__ == "__main__":
    key = jax.random.PRNGKey(0)
    kx, k1, k2, k3, k4, k5 = jax.random.split(key, 6)
    s = 0.1
    x = jax.random.normal(kx, (B, T, E), jnp.float32)
    wq = s * jax.random.normal(k1, (E, E), jnp.float32)   # heads concatenated on cols
    wk = s * jax.random.normal(k2, (E, E), jnp.float32)
    wv = s * jax.random.normal(k3, (E, E), jnp.float32)
    wp = s * jax.random.normal(k4, (E, E), jnp.float32)
    bp = s * jax.random.normal(k5, (1, E), jnp.float32)

    out = multihead_forward(x, wq, wk, wv, wp, bp)
    out = jax.block_until_ready(out)

    ref = reference_forward(x, wq, wk, wv, wp, bp)
    assert out.shape == (B, T, E)
    max_diff = float(jnp.max(jnp.abs(out - ref)))
    # tolerance accounts for bf16 MXU operands (f32 accumulation) in the kernel
    assert jnp.allclose(out, ref, atol=2e-2, rtol=2e-2), f"max abs diff {max_diff}"

    print("KERNEL_OK")
</pallas_src>

<mosaic_0001>
module attributes {stable_mosaic.version = 11 : i64} {
  func.func @multihead_kernel(%arg0: memref<16x32xf32, #tpu.memory_space<vmem>>, %arg1: memref<32x192xbf16, #tpu.memory_space<vmem>>, %arg2: memref<64x64xf32, #tpu.memory_space<vmem>>, %arg3: memref<1x32xf32, #tpu.memory_space<vmem>>, %arg4: memref<16x32xf32, #tpu.memory_space<vmem>>) attributes {dimension_semantics = [], scalar_prefetch = 0 : i64, scratch_operands = 0 : i64, tpu.core_type = #tpu.core_type<tc>} {
    %c0 = arith.constant 0 : index
    %c0_0 = arith.constant 0 : index
    %0 = vector.load %arg0[%c0, %c0_0] : memref<16x32xf32, #tpu.memory_space<vmem>>, vector<16x32xf32>
    %1 = arith.truncf %0 : vector<16x32xf32> to vector<16x32xbf16>
    %c0_1 = arith.constant 0 : index
    %c0_2 = arith.constant 0 : index
    %2 = vector.load %arg1[%c0_1, %c0_2] : memref<32x192xbf16, #tpu.memory_space<vmem>>, vector<32x192xbf16>
    %cst = arith.constant dense<0.000000e+00> : vector<16x192xf32>
    %3 = tpu.matmul %1, %2, %cst {dimension_numbers = #tpu.dot_dimension_numbers<[1], [0], [0], [1], [0, 0, 1, 1], [], []>} : vector<16x32xbf16>, vector<32x192xbf16>, vector<16x192xf32> -> vector<16x192xf32>
    %4 = vector.extract_strided_slice %3 {offsets = [0, 0], sizes = [16, 32], strides = [1, 1]} : vector<16x192xf32> to vector<16x32xf32>
    %5 = vector.extract_strided_slice %3 {offsets = [0, 32], sizes = [16, 32], strides = [1, 1]} : vector<16x192xf32> to vector<16x32xf32>
    %6 = vector.extract_strided_slice %3 {offsets = [0, 64], sizes = [16, 128], strides = [1, 1]} : vector<16x192xf32> to vector<16x128xf32>
    %7 = vector.extract_strided_slice %4 {offsets = [0, 0], sizes = [16, 8], strides = [1, 1]} : vector<16x32xf32> to vector<16x8xf32>
    %8 = vector.extract_strided_slice %4 {offsets = [0, 8], sizes = [16, 8], strides = [1, 1]} : vector<16x32xf32> to vector<16x8xf32>
    %9 = vector.extract_strided_slice %4 {offsets = [0, 16], sizes = [16, 8], strides = [1, 1]} : vector<16x32xf32> to vector<16x8xf32>
    %10 = vector.extract_strided_slice %4 {offsets = [0, 24], sizes = [16, 8], strides = [1, 1]} : vector<16x32xf32> to vector<16x8xf32>
    %11 = tpu.concatenate %7, %8, %9, %10 in 0 : vector<16x8xf32>, vector<16x8xf32>, vector<16x8xf32>, vector<16x8xf32> -> vector<64x8xf32>
    %12 = vector.extract_strided_slice %5 {offsets = [0, 0], sizes = [16, 8], strides = [1, 1]} : vector<16x32xf32> to vector<16x8xf32>
    %13 = vector.extract_strided_slice %5 {offsets = [0, 8], sizes = [16, 8], strides = [1, 1]} : vector<16x32xf32> to vector<16x8xf32>
    %14 = vector.extract_strided_slice %5 {offsets = [0, 16], sizes = [16, 8], strides = [1, 1]} : vector<16x32xf32> to vector<16x8xf32>
    %15 = vector.extract_strided_slice %5 {offsets = [0, 24], sizes = [16, 8], strides = [1, 1]} : vector<16x32xf32> to vector<16x8xf32>
    %16 = tpu.concatenate %12, %13, %14, %15 in 0 : vector<16x8xf32>, vector<16x8xf32>, vector<16x8xf32>, vector<16x8xf32> -> vector<64x8xf32>
    %17 = vector.extract_strided_slice %6 {offsets = [0, 0], sizes = [16, 32], strides = [1, 1]} : vector<16x128xf32> to vector<16x32xf32>
    %18 = vector.extract_strided_slice %6 {offsets = [0, 32], sizes = [16, 32], strides = [1, 1]} : vector<16x128xf32> to vector<16x32xf32>
    %19 = vector.extract_strided_slice %6 {offsets = [0, 64], sizes = [16, 32], strides = [1, 1]} : vector<16x128xf32> to vector<16x32xf32>
    %20 = vector.extract_strided_slice %6 {offsets = [0, 96], sizes = [16, 32], strides = [1, 1]} : vector<16x128xf32> to vector<16x32xf32>
    %21 = tpu.concatenate %17, %18, %19, %20 in 0 : vector<16x32xf32>, vector<16x32xf32>, vector<16x32xf32>, vector<16x32xf32> -> vector<64x32xf32>
    %22 = arith.truncf %11 : vector<64x8xf32> to vector<64x8xbf16>
    %23 = arith.truncf %16 : vector<64x8xf32> to vector<64x8xbf16>
    %cst_3 = arith.constant dense<0.000000e+00> : vector<64x64xf32>
    %24 = tpu.matmul %22, %23, %cst_3 {dimension_numbers = #tpu.dot_dimension_numbers<[1], [1], [0], [0], [0, 0, 1, 0], [], []>} : vector<64x8xbf16>, vector<64x8xbf16>, vector<64x64xf32> -> vector<64x64xf32>
    %c0_4 = arith.constant 0 : index
    %c0_5 = arith.constant 0 : index
    %25 = vector.load %arg2[%c0_4, %c0_5] : memref<64x64xf32, #tpu.memory_space<vmem>>, vector<64x64xf32>
    %26 = arith.addf %24, %25 : vector<64x64xf32>
    %cst_6 = arith.constant dense<0xFF800000> : vector<64xf32>
    %27 = vector.multi_reduction <maximumf>, %26, %cst_6 [1] : vector<64x64xf32> to vector<64xf32>
    %28 = vector.shape_cast %27 : vector<64xf32> to vector<64x1xf32>
    %29 = vector.broadcast %28 : vector<64x1xf32> to vector<64x64xf32>
    %30 = arith.subf %26, %29 : vector<64x64xf32>
    %31 = math.exp %30 : vector<64x64xf32>
    %cst_7 = arith.constant dense<0.000000e+00> : vector<64xf32>
    %32 = vector.multi_reduction <add>, %31, %cst_7 [1] : vector<64x64xf32> to vector<64xf32>
    %33 = vector.shape_cast %32 : vector<64xf32> to vector<64x1xf32>
    %cst_8 = arith.constant 1.000000e+00 : f32
    %34 = vector.broadcast %cst_8 : f32 to vector<64x1xf32>
    %35 = arith.divf %34, %33 : vector<64x1xf32>
    %36 = vector.broadcast %35 : vector<64x1xf32> to vector<64x64xf32>
    %37 = arith.mulf %31, %36 : vector<64x64xf32>
    %38 = arith.truncf %37 : vector<64x64xf32> to vector<64x64xbf16>
    %39 = arith.truncf %21 : vector<64x32xf32> to vector<64x32xbf16>
    %cst_9 = arith.constant dense<0.000000e+00> : vector<64x32xf32>
    %40 = tpu.matmul %38, %39, %cst_9 {dimension_numbers = #tpu.dot_dimension_numbers<[1], [0], [0], [1], [0, 0, 1, 1], [], []>} : vector<64x64xbf16>, vector<64x32xbf16>, vector<64x32xf32> -> vector<64x32xf32>
    %41 = vector.extract_strided_slice %40 {offsets = [0, 0], sizes = [16, 32], strides = [1, 1]} : vector<64x32xf32> to vector<16x32xf32>
    %42 = vector.extract_strided_slice %40 {offsets = [16, 0], sizes = [16, 32], strides = [1, 1]} : vector<64x32xf32> to vector<16x32xf32>
    %43 = arith.addf %41, %42 : vector<16x32xf32>
    %44 = vector.extract_strided_slice %40 {offsets = [32, 0], sizes = [16, 32], strides = [1, 1]} : vector<64x32xf32> to vector<16x32xf32>
    %45 = arith.addf %43, %44 : vector<16x32xf32>
    %46 = vector.extract_strided_slice %40 {offsets = [48, 0], sizes = [16, 32], strides = [1, 1]} : vector<64x32xf32> to vector<16x32xf32>
    %47 = arith.addf %45, %46 : vector<16x32xf32>
    %c0_10 = arith.constant 0 : index
    %c0_11 = arith.constant 0 : index
    %48 = vector.load %arg3[%c0_10, %c0_11] : memref<1x32xf32, #tpu.memory_space<vmem>>, vector<1x32xf32>
    %49 = vector.broadcast %48 : vector<1x32xf32> to vector<16x32xf32>
    %50 = arith.addf %47, %49 : vector<16x32xf32>
    %c0_12 = arith.constant 0 : index
    %c0_13 = arith.constant 0 : index
    %51 = vector.load %arg4[%c0_12, %c0_13] : memref<16x32xf32, #tpu.memory_space<vmem>>, vector<16x32xf32>
    tpu.vector_store %arg4[%c0_12, %c0_13], %50 {strides = array<i32>} : memref<16x32xf32, #tpu.memory_space<vmem>>, vector<16x32xf32>,
    return
  }
}

</mosaic_0001>

<bundles_post_ra>
// kernel: multihead_forward.1
= control target key start
LH: loop header
LB: loop body
LE: loop exit
PB: predicated region body
PF: predicated region fallthrough
CT: control target
= control target key end

     0   :  { %v642_v2 = vmov 0   ;;  %s816_s0 = inlined_call_operand.vmem [shape: f32[16,32], index: 0, kind: input, shape index: {}]   ;;  %s817_s1 = inlined_call_operand.vmem [shape: bf16[32,192], index: 1, kind: input, shape index: {}]   ;;  %s818_s2 = inlined_call_operand.vmem [shape: f32[64,64], index: 2, kind: input, shape index: {}]   ;;  %s819_s3 = inlined_call_operand.vmem [shape: f32[1,32], index: 3, kind: input, shape index: {}]   ;;  %s820_s4 = inlined_call_operand.hbm [shape: f32[16,32], index: 4, kind: output, shape index: {}]  }
   0x1   :  { %v582_v0 = vld [vmem:[%s817_s1 + $0x14] ss:$8 sps:$4 sm:$0xff]   ;;  %v584_v1 = vld [vmem:[%s817_s1 + $0x10] ss:$8 sps:$4 sm:$0xff]   ;;  %82 = vmatprep.mubr.bf16.mxu0 %v642_v2  ;;  %v585_v3 = vld [vmem:[%s817_s1 + $0x4] ss:$8 sps:$4 sm:$0xff]  }
   0x2   :  { %62 = vmatprep.subr.bf16.mxu0 %v582_v0  ;;  %v587_v4 = vld [vmem:[%s817_s1] ss:$8 sps:$4 sm:$0xff]  }
   0x3   :  { %63 = vmatpush1.bf16.msra.mxu0 %v584_v1  ;;  %v19_v5 = vld [vmem:[%s816_s0] sm:$0xff]  ;;  %v20_v6 = vld [vmem:[%s816_s0 + $0x8] sm:$0xff] }
   0x4   :  { %9 = vsyncpa [#allocation3], 0  ;;  %64 = vmatprep.subr.bf16.mxu0 %v585_v3  ;;  %v21_v7 = vpack.c.bf16 %v20_v6, %v19_v5  ;;  %vm46_vm0 = vcmask 261120   ;;  %vm157_vm1 = vcmask 64512   ;;  %s643_s1 = smov 120   ;;  %s644_s0 = smov 104  }
   0x5   :  { %s645_s27 = smov 112   ;;  %s646_s28 = smov 96   ;;  %v139_v33 = vld [vmem:[%s818_s2 + $0x10] sm:$0xff]  ;;  %v137_v35 = vld [vmem:[%s818_s2] sm:$0xff]  ;;  %vm247_vm2 = vcmask 523264   ;;  %v140_v38 = vld [vmem:[%s818_s2 + $0x18] sm:$0xff] }
   0x6   :  { %v138_v42 = vld [vmem:[%s818_s2 + $0x8] sm:$0xff]  ;;  %v143_v46 = vld [vmem:[%s818_s2 + $0x30] sm:$0xff]  ;;  %v141_v53 = vld [vmem:[%s818_s2 + $0x20] sm:$0xff]  ;;  %s648_s19 = smov 32   ;;  %s649_s22 = smov [#allocation2]  }
   0x7   :  { %65 = vmatpush1.bf16.msra.mxu0 %v587_v4  ;;  %v144_v54 = vld [vmem:[%s818_s2 + $0x38] sm:$0xff]  ;;  %v142_v56 = vld [vmem:[%s818_s2 + $0x28] sm:$0xff]  ;;  %s647_s2 = smov 64   ;;  %s465_s23 = sshll.u32 %s649_s22, 4  ;;  %s466_s23 = int_to_ptr.vmem [resolvable:$true] %s465_s23 }
   0x8   :  { %s620_s24 = scalar_lea.vmem %s466_s23, 256  ;;  %p625_p1 = scmp.lt.s32.totalorder %s466_s23, %s466_s23 }
   0x9   :  { %p621_p0 = scmp.ne.s32.totalorder %s466_s23, %s620_s24  ;;  %p626_p2 = scmp.lt.s32.totalorder %s620_s24, %s620_s24 }
   0xa   :  { %480 = vmatmul.mubr.msk.bf16.vlgmr.msra.gmra.mxu0 %vm46_vm0, %v21_v7 }
   0xb   :  { %p627_p3 = por %p626_p2, %p625_p1 }
   0xd   :  { %p628_p4 = pnand %p627_p3, %p621_p0 }
  0xca   :  { %v84_v8 = vpop.f32.mrf.mxu0 }
  0xcc   :  { %v696_v9 = vpop.f32.mrf.mxu0 }
  0xce   :  { %v88_v10 = vpop.f32.mrf.mxu0 }
  0xcf   :  { %v698_v11 = vpack.i.bf16 %v88_v10, %v84_v8  ;;  %v700_v12 = vpack.c.bf16 %v88_v10, %v84_v8 }
  0xd0   :  { %v90_v1 = vpop.f32.mrf.mxu0 }
  0xd1   :  { %563 = vrot.lane.b32.xlu1 %v698_v11, %s643_s1  ;;  %553 = vrot.lane.b32.xlu0 %v698_v11, %s644_s0  ;;  %v572_v2 = vpack.i.bf16 %v90_v1, %v696_v9 }
  0xd2   :  { %514 = vmatprep.mubr.msk.bf16.mxu1 %vm157_vm1, %v700_v12 }
  0xd5   :  { %558 = vrot.lane.b32.xlu0 %v698_v11, %s645_s27 }
 0x143   :  { %v564_v13 = vpop.permute.xlu1 %563  ;;  %v554_v14 = vpop.permute.xlu0 %553 }
 0x144   :  { %v556_v15 = vunpack.i.h.bf16 %v554_v14  ;;  %v555_v16 = vunpack.i.l.bf16 %v554_v14  ;;  %v566_v17 = vunpack.i.h.bf16 %v564_v13  ;;  %v565_v18 = vunpack.i.l.bf16 %v564_v13 }
 0x146   :  { %v136_v19 = vpack.c.bf16 %v556_v15, %v555_v16  ;;  %v134_v23 = vpack.c.bf16 %v566_v17, %v565_v18 }
 0x147   :  { %v559_v20 = vpop.permute.xlu0 %558 }
 0x148   :  { %v561_v21 = vunpack.i.h.bf16 %v559_v20  ;;  %v560_v22 = vunpack.i.l.bf16 %v559_v20  ;;  %155 = vrot.lane.b32.xlu1 %v136_v19, %s646_s28 }
 0x14a   :  { %v135_v24 = vpack.c.bf16 %v561_v21, %v560_v22 }
 0x14c   :  { %153 = vrot.lane.b32.xlu0 %v135_v24, %s646_s28  ;;  %151 = vrot.lane.b32.xlu1 %v134_v23, %s646_s28 }
 0x150   :  { %149 = vrot.lane.b32.xlu0 %v700_v12, %s646_s28 }
 0x1ba   :  { %v156_v25 = vpop.permute.xlu1 %155 }
 0x1bb   :  { %538 = vmatprep.subr.msk.bf16.mxu1 %vm157_vm1, %v156_v25  ;;  %v180_v26 = vsel %vm157_vm1, %v156_v25, 0 }
 0x1bc   :  { %507 = vmatpush3.bf16.xpose.msra.mxu1 %v180_v26 }
 0x1be   :  { %v154_v27 = vpop.permute.xlu0 %153  ;;  %v152_v29 = vpop.permute.xlu1 %151 }
 0x1bf   :  { %539 = vmatprep.subr.msk.bf16.mxu1 %vm157_vm1, %v154_v27  ;;  %v177_v28 = vsel %vm157_vm1, %v154_v27, 0  ;;  %v174_v30 = vsel %vm157_vm1, %v152_v29, 0 }
 0x1c2   :  { %v150_v31 = vpop.permute.xlu0 %149 }
 0x1c3   :  { %v171_v32 = vsel %vm157_vm1, %v150_v31, 0 }
 0x1c4   :  { %509 = vmatpush3.bf16.xpose.msra.mxu1 %v177_v28 }
 0x1c5   :  { %540 = vmatprep.subr.msk.bf16.mxu1 %vm157_vm1, %v152_v29 }
 0x1cc   :  { %511 = vmatpush3.bf16.xpose.msra.mxu1 %v174_v30 }
 0x1cd   :  { %541 = vmatprep.subr.msk.bf16.mxu1 %vm157_vm1, %v150_v31 }
 0x1d4   :  { %513 = vmatpush3.bf16.xpose.msra.mxu1 %v171_v32 }
 0x1db   :  { %515 = vmatmul.mubr.msk.bf16.vlgmr.msra.gmra.mxu1 %vm157_vm1, %v134_v23 }
 0x1dc   :  { %518 = vmatprep.mubr.msk.bf16.mxu1 %vm157_vm1, %v135_v24 }
 0x1e3   :  { %519 = vmatmul.mubr.msk.bf16.gmra.mxu1 %vm157_vm1, %v136_v19 }
 0x29b   :  { %v516_v34 = vpop.f32.mrf.mxu1 }
 0x29c   :  { %v225_v36 = vadd.f32 %v516_v34, %v139_v33 }
 0x29d   :  { %v216_v37 = vpop.f32.mrf.mxu1 }
 0x29e   :  { %v217_v39 = vadd.f32 %v216_v37, %v137_v35  ;;  %v254_v40 = vsel %vm247_vm2, %v225_v36, -inf }
 0x29f   :  { %255 = vmax.xlane.f32.xlu0 %v254_v40  ;;  %v517_v41 = vpop.f32.mrf.mxu1 }
 0x2a0   :  { %v228_v43 = vadd.f32 %v517_v41, %v140_v38  ;;  %v248_v44 = vsel %vm247_vm2, %v217_v39, -inf }
 0x2a1   :  { %v219_v45 = vpop.f32.mrf.mxu1  ;;  %249 = vmax.xlane.f32.xlu1 %v248_v44 }
 0x2a2   :  { %v740_v47 = vadd.f32 %v219_v45, %v138_v42  ;;  %v257_v51 = vsel %vm247_vm2, %v228_v43, -inf }
 0x2a3   :  { %v520_v48 = vpop.f32.mrf.mxu1 }
 0x2a4   :  { %v742_v49 = vadd.f32 %v520_v48, %v143_v46  ;;  %v251_v50 = vsel %vm247_vm2, %v740_v47, -inf }
 0x2a5   :  { %v232_v52 = vpop.f32.mrf.mxu1  ;;  %252 = vmax.xlane.f32.xlu0 %v251_v50  ;;  %258 = vmax.xlane.f32.xlu1 %v257_v51 }
 0x2a6   :  { %v756_v57 = vadd.f32 %v232_v52, %v141_v53  ;;  %v266_v59 = vsel %vm247_vm2, %v742_v49, -inf }
 0x2a7   :  { %v521_v55 = vpop.f32.mrf.mxu1 }
 0x2a8   :  { %v244_v58 = vadd.f32 %v521_v55, %v144_v54  ;;  %v260_v63 = vsel %vm247_vm2, %v756_v57, -inf }
 0x2a9   :  { %v235_v60 = vpop.f32.mrf.mxu1  ;;  %267 = vmax.xlane.f32.xlu0 %v266_v59 }
 0x2aa   :  { %v236_v61 = vadd.f32 %v235_v60, %v142_v56  ;;  %v269_v62 = vsel %vm247_vm2, %v244_v58, -inf }
 0x2ab   :  { %270 = vmax.xlane.f32.xlu1 %v269_v62 }
 0x2ac   :  { %v263_v0 = vsel %vm247_vm2, %v236_v61, -inf }
 0x2ad   :  { %261 = vmax.xlane.f32.xlu0 %v260_v63 }
 0x2af   :  { %264 = vmax.xlane.f32.xlu1 %v263_v0 }
 0x2c0   :  { %573 = vrot.lane.b32.xlu1 %v572_v2, %s647_s2 }
 0x2c3   :  { %568 = vrot.lane.b32.xlu0 %v572_v2, %s648_s19 }
 0x2c4   :  { %578 = vrot.lane.b32.xlu1 %v698_v11, %s646_s28 }
 0x328   :  { %v256_v3 = vpop.xlane.xlu0 %255 }
 0x329   :  { %v274_v4 = vsub.f32 %v225_v36, %v256_v3 }
 0x32a   :  { %v250_v5 = vpop.xlane.xlu1 %249 }
 0x32b   :  { %v284_v6 = vmul.f32 1.442695, %v274_v4  ;;  %v272_v7 = vsub.f32 %v217_v39, %v250_v5 }
 0x32d   :  { %588 = vpow2.f32 %v284_v6  ;;  %v280_v8 = vmul.f32 1.442695, %v272_v7 }
 0x32e   :  { %v253_v10 = vpop.xlane.xlu0 %252  ;;  %v259_v13 = vpop.xlane.xlu1 %258 }
 0x32f   :  { %v275_v14 = vsub.f32 %v228_v43, %v259_v13  ;;  %590 = vpow2.f32 %v280_v8  ;;  %v273_v35 = vsub.f32 %v740_v47, %v253_v10 }
 0x331   :  { %v286_v9 = vmul.f32 1.442695, %v275_v14  ;;  %v282_v37 = vmul.f32 1.442695, %v273_v35 }
 0x332   :  { %v268_v15 = vpop.xlane.xlu0 %267 }
 0x333   :  { %592 = vpow2.f32 %v286_v9  ;;  %v278_v38 = vsub.f32 %v742_v49, %v268_v15 }
 0x334   :  { %v271_v16 = vpop.xlane.xlu1 %270 }
 0x335   :  { %v279_v17 = vsub.f32 %v244_v58, %v271_v16  ;;  %v292_v39 = vmul.f32 1.442695, %v278_v38 }
 0x336   :  { %v262_v18 = vpop.xlane.xlu0 %261 }
 0x337   :  { %v294_v19 = vmul.f32 1.442695, %v279_v17  ;;  %v276_v40 = vsub.f32 %v756_v57, %v262_v18 }
 0x338   :  { %v265_v20 = vpop.xlane.xlu1 %264 }
 0x339   :  { %594 = vpow2.f32 %v294_v19  ;;  %v277_v11 = vsub.f32 %v236_v61, %v265_v20  ;;  %v288_v41 = vmul.f32 1.442695, %v276_v40 }
 0x33a   :  { %v768_v21 = vpop.eup %588  ;;  %v569_v22 = vpop.permute.xlu0 %568 }
 0x33b   :  { %v290_v23 = vmul.f32 1.442695, %v277_v11  ;;  %v571_v24 = vunpack.i.h.bf16 %v569_v22  ;;  %v570_v25 = vunpack.i.l.bf16 %v569_v22  ;;  %v302_v26 = vsel %vm247_vm2, %v768_v21, 0.0 }
 0x33c   :  { %v772_v27 = vpop.eup %590  ;;  %303 = vadd.xlane.f32.xlu0 %v302_v26  ;;  %v574_v42 = vpop.permute.xlu1 %573 }
 0x33d   :  { %596 = vpow2.f32 %v290_v23  ;;  %v350_v28 = vpack.c.bf16 %v571_v24, %v570_v25  ;;  %v296_v29 = vsel %vm247_vm2, %v772_v27, 0.0  ;;  %v576_v43 = vunpack.i.h.bf16 %v574_v42 }
 0x33e   :  { %598 = vpow2.f32 %v282_v37  ;;  %v575_v44 = vunpack.i.l.bf16 %v574_v42 }
 0x33f   :  { %360 = vrot.lane.b32.xlu1 %v350_v28, %s647_s2  ;;  %600 = vpow2.f32 %v292_v39 }
 0x340   :  { %v777_v30 = vpop.eup %592  ;;  %297 = vadd.xlane.f32.xlu0 %v296_v29  ;;  %602 = vpow2.f32 %v288_v41  ;;  %v349_v46 = vpack.c.bf16 %v576_v43, %v575_v44  ;;  %v579_v52 = vpop.permute.xlu1 %578 }
 0x341   :  { %v305_v31 = vsel %vm247_vm2, %v777_v30, 0.0  ;;  %v581_v53 = vunpack.i.h.bf16 %v579_v52  ;;  %v580_v54 = vunpack.i.l.bf16 %v579_v52 }
 0x343   :  { %v348_v55 = vpack.c.bf16 %v581_v53, %v580_v54 }
 0x344   :  { %306 = vadd.xlane.f32.xlu0 %v305_v31 }
 0x346   :  { %v781_v32 = vpop.eup %594 }
 0x347   :  { %v317_v33 = vsel %vm247_vm2, %v781_v32, 0.0 }
 0x348   :  { %318 = vadd.xlane.f32.xlu0 %v317_v33  ;;  %v489_v33 = vld [vmem:[%s819_s3] ss:$0 sm:$0xff] }
 0x34a   :  { %v785_v34 = vpop.eup %596 }
 0x34b   :  { %v311_v36 = vsel %vm247_vm2, %v785_v34, 0.0  ;;  %v599_v45 = vpop.eup %598 }
 0x34c   :  { %312 = vadd.xlane.f32.xlu0 %v311_v36  ;;  %v299_v47 = vsel %vm247_vm2, %v599_v45, 0.0  ;;  %v601_v48 = vpop.eup %600 }
 0x34d   :  { %v314_v49 = vsel %vm247_vm2, %v601_v48, 0.0  ;;  %v603_v50 = vpop.eup %602 }
 0x34e   :  { %v308_v51 = vsel %vm247_vm2, %v603_v50, 0.0 }
 0x362   :  { %358 = vrot.lane.b32.xlu0 %v349_v46, %s647_s2 }
 0x363   :  { %300 = vadd.xlane.f32.xlu1 %v299_v47 }
 0x367   :  { %315 = vadd.xlane.f32.xlu1 %v314_v49 }
 0x36b   :  { %309 = vadd.xlane.f32.xlu1 %v308_v51 }
 0x37c   :  { %356 = vrot.lane.b32.xlu1 %v348_v55, %s647_s2 }
 0x380   :  { %354 = vrot.lane.b32.xlu1 %v700_v12, %s647_s2 }
 0x3b1   :  { %v361_v56 = vpop.permute.xlu1 %360 }
 0x3b2   :  { %522 = vmatprep.subr.bf16.mxu0 %v361_v56 }
 0x3b3   :  { %523 = vmatpush3.bf16.msra.mxu0 %v361_v56 }
 0x3c5   :  { %v304_v57 = vpop.xlane.xlu0 %303 }
 0x3c9   :  { %v298_v58 = vpop.xlane.xlu0 %297 }
 0x3ca   :  { %604 = vrcp.f32 %v298_v58 }
 0x3cd   :  { %v307_v59 = vpop.xlane.xlu0 %306 }
 0x3ce   :  { %606 = vrcp.f32 %v307_v59 }
 0x3cf   :  { %608 = vrcp.f32 %v304_v57 }
 0x3d1   :  { %v319_v60 = vpop.xlane.xlu0 %318 }
 0x3d5   :  { %v313_v61 = vpop.xlane.xlu0 %312 }
 0x3d7   :  { %v605_v1 = vpop.eup %604 }
 0x3d8   :  { %v336_v6 = vmul.f32 %v605_v1, %v772_v27 }
 0x3d9   :  { %v359_v62 = vpop.permute.xlu0 %358 }
 0x3da   :  { %524 = vmatprep.subr.bf16.mxu0 %v359_v62 }
 0x3db   :  { %525 = vmatpush3.bf16.msra.mxu0 %v359_v62  ;;  %v607_v2 = vpop.eup %606 }
 0x3dc   :  { %v609_v4 = vpop.eup %608  ;;  %v339_v8 = vmul.f32 %v607_v2, %v777_v30 }
 0x3dd   :  { %v338_v14 = vmul.f32 %v609_v4, %v768_v21 }
 0x3df   :  { %v345_v15 = vpack.c.bf16 %v339_v8, %v338_v14 }
 0x3ec   :  { %v301_v63 = vpop.xlane.xlu1 %300 }
 0x3ed   :  { %610 = vrcp.f32 %v301_v63 }
 0x3ee   :  { %612 = vrcp.f32 %v313_v61 }
 0x3f0   :  { %v316_v0 = vpop.xlane.xlu1 %315 }
 0x3f1   :  { %614 = vrcp.f32 %v316_v0 }
 0x3f2   :  { %616 = vrcp.f32 %v319_v60 }
 0x3f4   :  { %v310_v12 = vpop.xlane.xlu1 %309 }
 0x3f5   :  { %618 = vrcp.f32 %v310_v12 }
 0x3f8   :  { %v357_v3 = vpop.permute.xlu1 %356 }
 0x3f9   :  { %526 = vmatprep.subr.bf16.mxu0 %v357_v3 }
 0x3fa   :  { %v611_v5 = vpop.eup %610  ;;  %527 = vmatpush3.bf16.msra.mxu0 %v357_v3 }
 0x3fb   :  { %v337_v7 = vmul.f32 %v611_v5, %v599_v45  ;;  %v613_v9 = vpop.eup %612 }
 0x3fc   :  { %v355_v10 = vpop.permute.xlu1 %354  ;;  %v341_v20 = vmul.f32 %v613_v9, %v785_v34 }
 0x3fd   :  { %528 = vmatprep.subr.bf16.mxu0 %v355_v10  ;;  %v344_v13 = vpack.c.bf16 %v337_v7, %v336_v6 }
 0x3fe   :  { %529 = vmatpush3.bf16.msra.mxu0 %v355_v10  ;;  %v615_v16 = vpop.eup %614 }
 0x3ff   :  { %530 = vmatprep.mubr.msk.bf16.mxu0 %vm247_vm2, %v344_v13  ;;  %v617_v17 = vpop.eup %616  ;;  %v342_v11 = vmul.f32 %v615_v16, %v601_v48 }
 0x400   :  { %v343_v23 = vmul.f32 %v617_v17, %v781_v32 }
 0x401   :  { %531 = vmatmul.mubr.msk.bf16.vlgmr.msra.gmra.mxu0 %vm247_vm2, %v345_v15 }
 0x402   :  { %v619_v18 = vpop.eup %618  ;;  %v347_v21 = vpack.c.bf16 %v343_v23, %v342_v11 }
 0x403   :  { %v340_v19 = vmul.f32 %v619_v18, %v603_v50 }
 0x405   :  { %v346_v22 = vpack.c.bf16 %v341_v20, %v340_v19 }
 0x407   :  { %534 = vmatprep.mubr.msk.bf16.mxu0 %vm247_vm2, %v346_v22 }
 0x409   :  { %535 = vmatmul.mubr.msk.bf16.gmra.mxu0 %vm247_vm2, %v347_v21 }
 0x4c1   :  { %v532_v24 = vpop.f32.mrf.mxu0 }
 0x4c3   :  { %v412_v25 = vpop.f32.mrf.mxu0 }
 0x4c4   :  { %v443_v29 = vadd.f32 %v532_v24, %v412_v25 }
 0x4c5   :  { %v533_v26 = vpop.f32.mrf.mxu0 }
 0x4c7   :  { %v415_v27 = vpop.f32.mrf.mxu0 }
 0x4c8   :  { %v444_v35 = vadd.f32 %v533_v26, %v415_v27 }
 0x4c9   :  { %v536_v28 = vpop.f32.mrf.mxu0 }
 0x4cb   :  { %v428_v30 = vpop.f32.mrf.mxu0 }
 0x4cc   :  { %v445_v31 = vadd.f32 %v443_v29, %v428_v30 }
 0x4cd   :  { %v537_v34 = vpop.f32.mrf.mxu0 }
 0x4ce   :  { %v447_v32 = vadd.f32 %v536_v28, %v445_v31 }
 0x4cf   :  { %v431_v36 = vpop.f32.mrf.mxu0 }
 0x4d0   :  { %v456_v37 = vadd.f32 %v489_v33, %v447_v32  ;;  %v446_v38 = vadd.f32 %v444_v35, %v431_v36 }
 0x4d2   :  { %458 = vst.msk [vmem:[#allocation2] sm:$0xff] %vm46_vm0, %v456_v37  ;;  %v448_v39 = vadd.f32 %v537_v34, %v446_v38 }
 0x4d4   :  { %v457_v40 = vadd.f32 %v489_v33, %v448_v39 }
 0x4d6   :  { %459 = vst.msk [vmem:[#allocation2 + $0x8] sm:$0xff] %vm46_vm0, %v457_v40 }
 0x4d7   :  { %631 = shalt.err (!%p628_p4)
}
 0x4d8   :  { %s650_s3 = smov 128   ;;  %s651_s25 = smov 8  }
 0x4d9   :  { %471 = dma.vmem_to_hbm [thread:$0]  %s466_s23, 256, %s820_s4, [#allocation3], %s650_s3, %s650_s3, %s651_s25  }
 0x4da   :  { %640 = dma.done.wait [#allocation3], 256  }
 0x4db   :  { %641 = vsyncadd [#allocation3], 4294967040 }
 0x4dc   :  { %475 = vsyncpa [#allocation3], 1 }

</bundles_post_ra>
